<compile_context>
chip_gen: v6e
topology: v6e:2x2x1
jax: 0.10.0
libtpu: 0.0.40
codegen_flags: <defaults>
</compile_context>

<pallas_src>
import functools

import jax
import jax.numpy as jnp
from jax.experimental import pallas as pl
from jax.experimental.pallas import tpu as pltpu

_SELU_ALPHA = 1.6732632423543772
_SELU_SCALE = 1.0507009873554805
_LANE = 128
_SUBLANE = 8


def _selu(x):
    return _SELU_SCALE * jnp.where(x > 0, x, _SELU_ALPHA * (jnp.exp(x) - 1.0))


def _round_up(x, m):
    return ((x + m - 1) // m) * m


def _pad2(a, rows, cols, dtype):
    a = a.astype(jnp.float32)
    a = jnp.pad(a, ((0, rows - a.shape[0]), (0, cols - a.shape[1])))
    return a.astype(dtype)


# ----------------------------------------------------------------------------- #
# One-time parameter preparation (outside the per-forward trace)
# ----------------------------------------------------------------------------- #
def prepare_mlp_params(params):
    """Pad hidden/output feature dims to lane (128) multiples and cast matmul
    weights to bf16.  Zero padding is exact: padded W/b columns give
    pre-activation 0 and SELU(0)=0; padded W rows only multiply those zero
    columns.  Biases stay f32 (bias add + SELU run in f32 inside the kernel)."""
    w1, b1, w2, b2, w3, b3 = params
    k = w1.shape[0]
    h1_p = _round_up(w1.shape[1], _LANE)
    h2_p = _round_up(w2.shape[1], _LANE)
    do_p = _round_up(w3.shape[1], _LANE)
    return (
        _pad2(w1, k, h1_p, jnp.bfloat16),
        _pad2(b1.reshape(1, -1), 1, h1_p, jnp.float32),
        _pad2(w2, h1_p, h2_p, jnp.bfloat16),
        _pad2(b2.reshape(1, -1), 1, h2_p, jnp.float32),
        _pad2(w3, h2_p, do_p, jnp.bfloat16),
        _pad2(b3.reshape(1, -1), 1, do_p, jnp.float32),
    )


# ----------------------------------------------------------------------------- #
# Fused 3-layer SELU MLP kernel (Linear+SELU x3, activate_last=True)
# ----------------------------------------------------------------------------- #
def _fused_mlp_kernel(x_ref, w1_ref, b1_ref, w2_ref, b2_ref, w3_ref, b3_ref, o_ref):
    # Layer 1: single lane-dense bf16 dot over the (wrapper-fused) concat input.
    h = _selu(jnp.dot(x_ref[...], w1_ref[...],
                      preferred_element_type=jnp.float32) + b1_ref[...])
    # Layer 2
    h = _selu(jnp.dot(h.astype(jnp.bfloat16), w2_ref[...],
                      preferred_element_type=jnp.float32) + b2_ref[...])
    # Layer 3 (activate_last=True)
    h = _selu(jnp.dot(h.astype(jnp.bfloat16), w3_ref[...],
                      preferred_element_type=jnp.float32) + b3_ref[...])
    o_ref[...] = h.astype(o_ref.dtype)


def fused_mlp_pallas(x, prep, *, tile_m=512):
    """3-layer SELU MLP over the rows of x.

    x:    [R, K] (any float dtype; cast to bf16 for the MXU).
    prep: output of prepare_mlp_params (K must match prep's W1 rows).
    Returns [R, dout_p] bf16 with the output dim zero-padded to a lane multiple
    (caller slices / casts once).
    """
    w1, b1, w2, b2, w3, b3 = prep
    r, k = int(x.shape[0]), int(x.shape[1])
    assert int(w1.shape[0]) == k, (w1.shape, k)
    h1_p, h2_p, do_p = int(w1.shape[1]), int(w2.shape[1]), int(w3.shape[1])

    x = x.astype(jnp.bfloat16)

    # Row tiling: large blocks, but keep >= 2 grid steps when possible so the
    # "parallel" axis can shard across both TensorCores on v7x.  No host-side
    # row padding: Pallas masks the tail block.
    tile = min(int(tile_m), _round_up(max(-(-r // 2), _SUBLANE), _SUBLANE))
    grid = (pl.cdiv(r, tile),)

    in_specs = [
        pl.BlockSpec((tile, k), lambda i: (i, 0)),      # activations (row-tiled)
        pl.BlockSpec((k, h1_p), lambda i: (0, 0)),      # W1 (resident, const idx)
        pl.BlockSpec((1, h1_p), lambda i: (0, 0)),      # b1
        pl.BlockSpec((h1_p, h2_p), lambda i: (0, 0)),   # W2
        pl.BlockSpec((1, h2_p), lambda i: (0, 0)),      # b2
        pl.BlockSpec((h2_p, do_p), lambda i: (0, 0)),   # W3
        pl.BlockSpec((1, do_p), lambda i: (0, 0)),      # b3
    ]

    return pl.pallas_call(
        _fused_mlp_kernel,
        out_shape=jax.ShapeDtypeStruct((r, do_p), jnp.bfloat16),
        grid_spec=pltpu.PrefetchScalarGridSpec(
            num_scalar_prefetch=0,
            grid=grid,
            in_specs=in_specs,
            out_specs=pl.BlockSpec((tile, do_p), lambda i: (i, 0)),
        ),
        compiler_params=pltpu.CompilerParams(
            dimension_semantics=("parallel",)),
    )(x, w1, b1, w2, b2, w3, b3)


# ----------------------------------------------------------------------------- #
# Plain-JAX helpers (tiny shapes / data-dependent indexing / reference)
# ----------------------------------------------------------------------------- #
def _mlp_ref(x, params, matmul_dtype=None):
    """Plain-JAX 3-layer SELU MLP.  matmul_dtype=bf16 emulates kernel numerics."""
    w1, b1, w2, b2, w3, b3 = params

    def lin(h, w, b):
        if matmul_dtype is not None:
            h = h.astype(matmul_dtype)
            w = w.astype(matmul_dtype)
        return jnp.dot(h, w, preferred_element_type=jnp.float32) + b.reshape(1, -1)

    h = _selu(lin(x, w1, b1))
    h = _selu(lin(h, w2, b2))
    return _selu(lin(h, w3, b3))


def segment_reduce(data, seg_ids, num_segments, reduce="mean"):
    """torch_scatter.scatter(..., reduce=...) equivalent (zero for empty segments)."""
    s = jax.ops.segment_sum(data.astype(jnp.float32), seg_ids,
                            num_segments=num_segments)
    if reduce == "mean":
        cnt = jax.ops.segment_sum(
            jnp.ones((data.shape[0],), jnp.float32), seg_ids,
            num_segments=num_segments)
        s = s / jnp.maximum(cnt, 1.0)[:, None]
    return s


# ----------------------------------------------------------------------------- #
# Forward pass (matches TransformerLayerTorch.forward semantics)
# ----------------------------------------------------------------------------- #
def transformer_layer_forward(params, prep, atom_vec, bond_vec, state_vec, com_w,
                              atom_fea, edge_index, batch, *, batch_size,
                              pool_method="mean", use_pallas=True,
                              ref_matmul_dtype=None):
    n_nodes = atom_vec.shape[0]
    v_dim = atom_vec.shape[1]
    e_dim = bond_vec.shape[1]

    # TODO(synk): StoiRepTorch definition is not provided in the reference code;
    # using a composition-weighted segment pooling of atom_fea as a deterministic
    # stand-in.
    comp_che = segment_reduce(com_w[:, None] * atom_fea, batch, batch_size,
                              pool_method)

    # u = pooled state per graph
    u = segment_reduce(state_vec, batch, batch_size, pool_method)

    src, tgt = edge_index[0], edge_index[1]
    fs = jnp.take(atom_vec, tgt, axis=0)
    fr = jnp.take(atom_vec, src, axis=0)
    bond_batch = jnp.take(batch, tgt, axis=0)
    u_expand_e = jnp.take(u, bond_batch, axis=0)

    # phi_e over edges.  The concat fuses into the XLA gather producer, so the
    # kernel sees one lane-dense [E, 2v+e+u] operand -> single K=128 dot.
    phi_e_in = jnp.concatenate([fs, fr, bond_vec, u_expand_e], axis=-1)
    if use_pallas:
        bond_che = fused_mlp_pallas(phi_e_in, prep["phi_e"])[:, :e_dim]
        bond_che = bond_che.astype(jnp.float32)
    else:
        bond_che = _mlp_ref(phi_e_in, params["phi_e"], ref_matmul_dtype)

    b_ei_p = segment_reduce(bond_che, tgt, n_nodes, pool_method)
    u_expand_v = jnp.take(u, batch, axis=0)

    # phi_v over nodes.
    phi_v_in = jnp.concatenate([b_ei_p, atom_vec, u_expand_v], axis=-1)
    if use_pallas:
        atom_che = fused_mlp_pallas(phi_v_in, prep["phi_v"])[:, :v_dim]
        atom_che = atom_che.astype(jnp.float32)
    else:
        atom_che = _mlp_ref(phi_v_in, params["phi_v"], ref_matmul_dtype)

    # phi_u works on batch_size (~few) rows: launch/DMA cost >> compute -> JAX.
    b_e_p = segment_reduce(bond_che, bond_batch, batch_size, pool_method)
    b_v_p = segment_reduce(atom_che, batch, batch_size, pool_method)
    phi_u_input = jnp.concatenate([b_e_p, b_v_p, u], axis=-1)
    state_che = _mlp_ref(phi_u_input, params["phi_u"])

    state_che_broadcast = jnp.take(state_che, batch, axis=0)
    return atom_che, bond_che, state_che_broadcast, comp_che


# ----------------------------------------------------------------------------- #
# Parameter init (matches nn.Linear default init; weights stored as [in, out])
# ----------------------------------------------------------------------------- #
def _init_linear(key, fan_in, fan_out):
    kw, kb = jax.random.split(key)
    lim = 1.0 / jnp.sqrt(jnp.float32(fan_in))
    w = jax.random.uniform(kw, (fan_in, fan_out), jnp.float32, -lim, lim)
    b = jax.random.uniform(kb, (1, fan_out), jnp.float32, -lim, lim)
    return w, b


def _init_mlp(key, d_in, hidden_dims):
    dims = [d_in] + list(hidden_dims)
    keys = jax.random.split(key, len(hidden_dims))
    params = []
    for k, a, b in zip(keys, dims[:-1], dims[1:]):
        params.extend(_init_linear(k, a, b))
    return tuple(params)


if __name__ == "__main__":
    # Small synthetic problem (module defaults: hidden_units_* = [128, 128]).
    v_dim = e_dim = u_dim = 32
    hidden = [128, 128]
    N, E, B = 48, 96, 2
    fea_dim = 16

    key = jax.random.PRNGKey(0)
    ks = jax.random.split(key, 12)

    atom_vec = jax.random.normal(ks[0], (N, v_dim), jnp.float32)
    bond_vec = jax.random.normal(ks[1], (E, e_dim), jnp.float32)
    state_vec = jax.random.normal(ks[2], (N, u_dim), jnp.float32)
    com_w = jax.random.uniform(ks[3], (N,), jnp.float32)
    atom_fea = jax.random.normal(ks[4], (N, fea_dim), jnp.float32)
    edge_index = jax.random.randint(ks[5], (2, E), 0, N, dtype=jnp.int32)
    batch = jnp.concatenate(
        [jnp.zeros((N // 2,), jnp.int32), jnp.ones((N - N // 2,), jnp.int32)])

    params = {
        "phi_e": _init_mlp(ks[6], 2 * v_dim + e_dim + u_dim, hidden + [e_dim]),
        "phi_v": _init_mlp(ks[7], e_dim + v_dim + u_dim, hidden + [v_dim]),
        "phi_u": _init_mlp(ks[8], e_dim + v_dim + u_dim, hidden + [u_dim]),
    }
    # Pad / cast weights ONCE, outside the per-forward trace.
    prep = {"phi_e": prepare_mlp_params(params["phi_e"]),
            "phi_v": prepare_mlp_params(params["phi_v"])}

    # ---- Tight kernel-level check: Pallas vs bf16-matmul JAX reference. ----
    xt = jax.random.normal(ks[9], (200, e_dim + v_dim + u_dim), jnp.float32)
    out_k = fused_mlp_pallas(xt, prep["phi_v"])[:, :v_dim].astype(jnp.float32)
    out_r = _mlp_ref(xt, params["phi_v"], matmul_dtype=jnp.bfloat16)
    jax.block_until_ready((out_k, out_r))
    assert out_k.shape == out_r.shape
    assert bool(jnp.all(jnp.isfinite(out_k)))
    assert bool(jnp.allclose(out_k, out_r, atol=1e-2, rtol=1e-2)), (
        float(jnp.max(jnp.abs(out_k - out_r))))

    # ---- Full forward (jitted, Pallas path). ----
    fwd = jax.jit(functools.partial(
        transformer_layer_forward, batch_size=B, pool_method="mean"))
    atom_che, bond_che, state_che_b, comp_che = fwd(
        params, prep, atom_vec, bond_vec, state_vec, com_w, atom_fea,
        edge_index, batch)
    jax.block_until_ready((atom_che, bond_che, state_che_b, comp_che))

    assert atom_che.shape == (N, v_dim)
    assert bond_che.shape == (E, e_dim)
    assert state_che_b.shape == (N, u_dim)
    assert comp_che.shape == (B, fea_dim)
    assert bool(jnp.all(jnp.isfinite(atom_che)))
    assert bool(jnp.all(jnp.isfinite(bond_che)))
    assert bool(jnp.all(jnp.isfinite(state_che_b)))

    # End-to-end check vs a bf16-matmul JAX reference (same numerics as kernel):
    # catches indexing / padding / gather bugs at tight tolerance.
    a_r, b_r, s_r, c_r = transformer_layer_forward(
        params, prep, atom_vec, bond_vec, state_vec, com_w, atom_fea,
        edge_index, batch, batch_size=B, pool_method="mean", use_pallas=False,
        ref_matmul_dtype=jnp.bfloat16)
    assert bool(jnp.allclose(bond_che, b_r, atol=1e-2, rtol=1e-2))
    assert bool(jnp.allclose(atom_che, a_r, atol=1e-2, rtol=1e-2))
    assert bool(jnp.allclose(state_che_b, s_r, atol=1e-2, rtol=1e-2))
    assert bool(jnp.allclose(comp_che, c_r, atol=1e-5, rtol=1e-5))

    # Sanity check vs pure-f32 reference: bf16 matmuls stay within loose bounds.
    a_f, b_f, s_f, _ = transformer_layer_forward(
        params, prep, atom_vec, bond_vec, state_vec, com_w, atom_fea,
        edge_index, batch, batch_size=B, pool_method="mean", use_pallas=False)
    assert bool(jnp.allclose(bond_che, b_f, atol=5e-2, rtol=5e-2))
    assert bool(jnp.allclose(atom_che, a_f, atol=5e-2, rtol=5e-2))
    assert bool(jnp.allclose(state_che_b, s_f, atol=5e-2, rtol=5e-2))

    print("KERNEL_OK")
</pallas_src>

<mosaic_0001>
module attributes {stable_mosaic.version = 11 : i64} {
  func.func @_fused_mlp_kernel(%arg0: i32, %arg1: memref<104x96xbf16, #tpu.memory_space<vmem>>, %arg2: memref<96x128xbf16, #tpu.memory_space<vmem>>, %arg3: memref<1x128xf32, #tpu.memory_space<vmem>>, %arg4: memref<128x128xbf16, #tpu.memory_space<vmem>>, %arg5: memref<1x128xf32, #tpu.memory_space<vmem>>, %arg6: memref<128x128xbf16, #tpu.memory_space<vmem>>, %arg7: memref<1x128xf32, #tpu.memory_space<vmem>>, %arg8: memref<104x128xbf16, #tpu.memory_space<vmem>>) attributes {dimension_semantics = [#tpu.dimension_semantics<parallel>], iteration_bounds = array<i64: 2>, scalar_prefetch = 0 : i64, scratch_operands = 0 : i64, tpu.core_type = #tpu.core_type<tc>, window_params = [{transform_indices = @transform_0, window_bounds = array<i64: 104, 96>}, {pipeline_mode = #tpu.pipeline_mode<synchronous>, transform_indices = @transform_1, window_bounds = array<i64: 96, 128>}, {pipeline_mode = #tpu.pipeline_mode<synchronous>, transform_indices = @transform_2, window_bounds = array<i64: 1, 128>}, {pipeline_mode = #tpu.pipeline_mode<synchronous>, transform_indices = @transform_3, window_bounds = array<i64: 128, 128>}, {pipeline_mode = #tpu.pipeline_mode<synchronous>, transform_indices = @transform_4, window_bounds = array<i64: 1, 128>}, {pipeline_mode = #tpu.pipeline_mode<synchronous>, transform_indices = @transform_5, window_bounds = array<i64: 128, 128>}, {pipeline_mode = #tpu.pipeline_mode<synchronous>, transform_indices = @transform_6, window_bounds = array<i64: 1, 128>}, {transform_indices = @transform_7, window_bounds = array<i64: 104, 128>}]} {
    %c0 = arith.constant 0 : index
    %c0_0 = arith.constant 0 : index
    %0 = vector.load %arg1[%c0, %c0_0] : memref<104x96xbf16, #tpu.memory_space<vmem>>, vector<104x96xbf16>
    %c0_1 = arith.constant 0 : index
    %c0_2 = arith.constant 0 : index
    %1 = vector.load %arg2[%c0_1, %c0_2] : memref<96x128xbf16, #tpu.memory_space<vmem>>, vector<96x128xbf16>
    %cst = arith.constant dense<0.000000e+00> : vector<104x128xf32>
    %2 = tpu.matmul %0, %1, %cst {dimension_numbers = #tpu.dot_dimension_numbers<[1], [0], [0], [1], [0, 0, 1, 1], [], []>} : vector<104x96xbf16>, vector<96x128xbf16>, vector<104x128xf32> -> vector<104x128xf32>
    %c0_3 = arith.constant 0 : index
    %c0_4 = arith.constant 0 : index
    %3 = vector.load %arg3[%c0_3, %c0_4] : memref<1x128xf32, #tpu.memory_space<vmem>>, vector<1x128xf32>
    %4 = vector.broadcast %3 : vector<1x128xf32> to vector<104x128xf32>
    %5 = arith.addf %2, %4 : vector<104x128xf32>
    %cst_5 = arith.constant 0.000000e+00 : f32
    %6 = vector.broadcast %cst_5 : f32 to vector<104x128xf32>
    %7 = arith.cmpf ogt, %5, %6 : vector<104x128xf32>
    %8 = math.exp %5 : vector<104x128xf32>
    %cst_6 = arith.constant 1.000000e+00 : f32
    %9 = vector.broadcast %cst_6 : f32 to vector<104x128xf32>
    %10 = arith.subf %8, %9 : vector<104x128xf32>
    %cst_7 = arith.constant 1.67326319 : f32
    %11 = vector.broadcast %cst_7 : f32 to vector<104x128xf32>
    %12 = arith.mulf %11, %10 : vector<104x128xf32>
    %13 = arith.select %7, %5, %12 : vector<104x128xi1>, vector<104x128xf32>
    %cst_8 = arith.constant 1.05070102 : f32
    %14 = vector.broadcast %cst_8 : f32 to vector<104x128xf32>
    %15 = arith.mulf %14, %13 : vector<104x128xf32>
    %16 = arith.truncf %15 : vector<104x128xf32> to vector<104x128xbf16>
    %c0_9 = arith.constant 0 : index
    %c0_10 = arith.constant 0 : index
    %17 = vector.load %arg4[%c0_9, %c0_10] : memref<128x128xbf16, #tpu.memory_space<vmem>>, vector<128x128xbf16>
    %cst_11 = arith.constant dense<0.000000e+00> : vector<104x128xf32>
    %18 = tpu.matmul %16, %17, %cst_11 {dimension_numbers = #tpu.dot_dimension_numbers<[1], [0], [0], [1], [0, 0, 1, 1], [], []>} : vector<104x128xbf16>, vector<128x128xbf16>, vector<104x128xf32> -> vector<104x128xf32>
    %c0_12 = arith.constant 0 : index
    %c0_13 = arith.constant 0 : index
    %19 = vector.load %arg5[%c0_12, %c0_13] : memref<1x128xf32, #tpu.memory_space<vmem>>, vector<1x128xf32>
    %20 = vector.broadcast %19 : vector<1x128xf32> to vector<104x128xf32>
    %21 = arith.addf %18, %20 : vector<104x128xf32>
    %cst_14 = arith.constant 0.000000e+00 : f32
    %22 = vector.broadcast %cst_14 : f32 to vector<104x128xf32>
    %23 = arith.cmpf ogt, %21, %22 : vector<104x128xf32>
    %24 = math.exp %21 : vector<104x128xf32>
    %cst_15 = arith.constant 1.000000e+00 : f32
    %25 = vector.broadcast %cst_15 : f32 to vector<104x128xf32>
    %26 = arith.subf %24, %25 : vector<104x128xf32>
    %cst_16 = arith.constant 1.67326319 : f32
    %27 = vector.broadcast %cst_16 : f32 to vector<104x128xf32>
    %28 = arith.mulf %27, %26 : vector<104x128xf32>
    %29 = arith.select %23, %21, %28 : vector<104x128xi1>, vector<104x128xf32>
    %cst_17 = arith.constant 1.05070102 : f32
    %30 = vector.broadcast %cst_17 : f32 to vector<104x128xf32>
    %31 = arith.mulf %30, %29 : vector<104x128xf32>
    %32 = arith.truncf %31 : vector<104x128xf32> to vector<104x128xbf16>
    %c0_18 = arith.constant 0 : index
    %c0_19 = arith.constant 0 : index
    %33 = vector.load %arg6[%c0_18, %c0_19] : memref<128x128xbf16, #tpu.memory_space<vmem>>, vector<128x128xbf16>
    %cst_20 = arith.constant dense<0.000000e+00> : vector<104x128xf32>
    %34 = tpu.matmul %32, %33, %cst_20 {dimension_numbers = #tpu.dot_dimension_numbers<[1], [0], [0], [1], [0, 0, 1, 1], [], []>} : vector<104x128xbf16>, vector<128x128xbf16>, vector<104x128xf32> -> vector<104x128xf32>
    %c0_21 = arith.constant 0 : index
    %c0_22 = arith.constant 0 : index
    %35 = vector.load %arg7[%c0_21, %c0_22] : memref<1x128xf32, #tpu.memory_space<vmem>>, vector<1x128xf32>
    %36 = vector.broadcast %35 : vector<1x128xf32> to vector<104x128xf32>
    %37 = arith.addf %34, %36 : vector<104x128xf32>
    %cst_23 = arith.constant 0.000000e+00 : f32
    %38 = vector.broadcast %cst_23 : f32 to vector<104x128xf32>
    %39 = arith.cmpf ogt, %37, %38 : vector<104x128xf32>
    %40 = math.exp %37 : vector<104x128xf32>
    %cst_24 = arith.constant 1.000000e+00 : f32
    %41 = vector.broadcast %cst_24 : f32 to vector<104x128xf32>
    %42 = arith.subf %40, %41 : vector<104x128xf32>
    %cst_25 = arith.constant 1.67326319 : f32
    %43 = vector.broadcast %cst_25 : f32 to vector<104x128xf32>
    %44 = arith.mulf %43, %42 : vector<104x128xf32>
    %45 = arith.select %39, %37, %44 : vector<104x128xi1>, vector<104x128xf32>
    %cst_26 = arith.constant 1.05070102 : f32
    %46 = vector.broadcast %cst_26 : f32 to vector<104x128xf32>
    %47 = arith.mulf %46, %45 : vector<104x128xf32>
    %48 = arith.truncf %47 : vector<104x128xf32> to vector<104x128xbf16>
    %c0_27 = arith.constant 0 : index
    %c0_28 = arith.constant 0 : index
    %49 = vector.load %arg8[%c0_27, %c0_28] : memref<104x128xbf16, #tpu.memory_space<vmem>>, vector<104x128xbf16>
    tpu.vector_store %arg8[%c0_27, %c0_28], %48 {strides = array<i32>} : memref<104x128xbf16, #tpu.memory_space<vmem>>, vector<104x128xbf16>,
    return
  }
  func.func @transform_0(%arg0: i32) -> (i32, i32) {
    %c0_i32 = arith.constant 0 : i32
    %c0_i32_0 = arith.constant 0 : i32
    return %arg0, %c0_i32 : i32, i32
  }
  func.func @transform_1(%arg0: i32) -> (i32, i32) {
    %c0_i32 = arith.constant 0 : i32
    %c0_i32_0 = arith.constant 0 : i32
    %c0_i32_1 = arith.constant 0 : i32
    return %c0_i32, %c0_i32_0 : i32, i32
  }
  func.func @transform_2(%arg0: i32) -> (i32, i32) {
    %c0_i32 = arith.constant 0 : i32
    %c0_i32_0 = arith.constant 0 : i32
    %c0_i32_1 = arith.constant 0 : i32
    return %c0_i32, %c0_i32_0 : i32, i32
  }
  func.func @transform_3(%arg0: i32) -> (i32, i32) {
    %c0_i32 = arith.constant 0 : i32
    %c0_i32_0 = arith.constant 0 : i32
    %c0_i32_1 = arith.constant 0 : i32
    return %c0_i32, %c0_i32_0 : i32, i32
  }
  func.func @transform_4(%arg0: i32) -> (i32, i32) {
    %c0_i32 = arith.constant 0 : i32
    %c0_i32_0 = arith.constant 0 : i32
    %c0_i32_1 = arith.constant 0 : i32
    return %c0_i32, %c0_i32_0 : i32, i32
  }
  func.func @transform_5(%arg0: i32) -> (i32, i32) {
    %c0_i32 = arith.constant 0 : i32
    %c0_i32_0 = arith.constant 0 : i32
    %c0_i32_1 = arith.constant 0 : i32
    return %c0_i32, %c0_i32_0 : i32, i32
  }
  func.func @transform_6(%arg0: i32) -> (i32, i32) {
    %c0_i32 = arith.constant 0 : i32
    %c0_i32_0 = arith.constant 0 : i32
    %c0_i32_1 = arith.constant 0 : i32
    return %c0_i32, %c0_i32_0 : i32, i32
  }
  func.func @transform_7(%arg0: i32) -> (i32, i32) {
    %c0_i32 = arith.constant 0 : i32
    %c0_i32_0 = arith.constant 0 : i32
    return %arg0, %c0_i32 : i32, i32
  }
}

</mosaic_0001>

<bundles_post_ra>
// kernel: tpu_custom_call.1
= control target key start
LH: loop header
LB: loop body
LE: loop exit
PB: predicated region body
PF: predicated region fallthrough
CT: control target
= control target key end

     0   :  { %12 = vsyncpa [#allocation3], 0  ;;  %s2300_s0 = inlined_call_operand.vmem [shape: bf16[200,96], index: 0, kind: input, shape index: {}]   ;;  %s2301_s1 = inlined_call_operand.vmem [shape: bf16[96,128], index: 1, kind: input, shape index: {}]   ;;  %s2302_s2 = inlined_call_operand.vmem [shape: f32[1,128], index: 2, kind: input, shape index: {}]   ;;  %s2303_s3 = inlined_call_operand.vmem [shape: bf16[128,128], index: 3, kind: input, shape index: {}]   ;;  %s2304_s4 = inlined_call_operand.vmem [shape: f32[1,128], index: 4, kind: input, shape index: {}]   ;;  %s2305_s5 = inlined_call_operand.vmem [shape: bf16[128,128], index: 5, kind: input, shape index: {}]   ;;  %s2306_s6 = inlined_call_operand.vmem [shape: f32[1,128], index: 6, kind: input, shape index: {}]   ;;  %s2307_s7 = inlined_call_operand.hbm [shape: bf16[200,128], index: 7, kind: output, shape index: {}]  }
   0x1   :  { %14 = vsyncpa [#allocation3 + $0x1], 0  ;;  %s1861_s24 = smov 0   ;;  %s1863_s25 = smov 0  }
   0x2   :  { %s1865_s26 = smov 0   ;;  %s1867_s27 = smov 0  }
   0x3 LB: > { %s1882_s28 = sadd.s32 4294967295, %s1814_s27   ;;  %s1269_s29 = sadd.s32 4294967294, %s1814_s27   ;;  %s1814_s27 = sphi %s1867_s27, %s2313_s27   ;;  %s1810_s26 = sphi %s1865_s26, %s2312_s26   ;;  %s1806_s25 = sphi %s1863_s25, %s2311_s25   ;;  %s1802_s24 = sphi %s1861_s24, %s2310_s24  }
   0x4   : > { %s1886_s30 = sadd.s32 1, %s1814_s27   ;;  %s179_s8 = sadd.s32 1, %s1810_s26 }
   0x5   : > { %s176_s9 = ssub.s32 %s1814_s27, %s1886_s30  ;;  %p189_p0 = scmp.ne.s32.totalorder %s1810_s26, %s1806_s25 }
   0x6   : > { %p177_p1 = scmp.eq.s32.totalorder %s176_s9, 0  ;;  %p190_p2 = scmp.eq.s32.totalorder %s1882_s28, 1 }
   0x7   : > { %p195_p3 = scmp.ne.s32.totalorder %s1806_s25, %s1802_s24  ;;  %p196_p4 = scmp.eq.s32.totalorder %s1269_s29, 1 }
   0x8   : > { %s1897_s10 = scalar_select %p177_p1, %s1810_s26, %s179_s8  }
   0x9   : > { %p1899_p5 = por %p190_p2, %p189_p0  ;;  %p1903_p6 = por %p196_p4, %p195_p3 }
   0xa   : > { %p1272_p7 = scmp.ge.s32.totalorder %s1814_s27, 1  ;;  %p249_p8 = scmp.lt.s32.totalorder %s1814_s27, 3 }
   0xc   : > { %p250_p9 = pnand %p1272_p7, %p249_p8 }
   0xd   : > { %s1918_s17 = smul.u32 (!%p250_p9), 13, %s1882_s28  ;;  %s282_s14 = sand.u32 (!%p250_p9), 1, %s1806_s25  }
   0xe   : > { %253 = sbr.rel (%p250_p9) target bundleno = 788 (0x314), region = 48 }
   0xf   : > { %p290_p10 = scmp.lt.s32.totalorder (!%p250_p9), %s1918_s17, 24  ;;  %s1604_s18 = smul.u32 (!%p250_p9), 52, %s282_s14 }
  0x11   : > { %s2211_s19 = scalar_lea.vmem (!%p250_p9), [#allocation2], %s1604_s18 }
  0x13   : > { %v1647_v0 = vld [vmem:[%s2301_s1 + $0x28] sm:$0xff]   ;;  %v1816_v1 = vmov 0.0   ;;  %v1648_v2 = vld [vmem:[%s2301_s1 + $0x20] sm:$0xff]   ;;  %vm1817_vm0 = vmmov 0   ;;  %v1649_v3 = vld [vmem:[%s2301_s1 + $0x18] sm:$0xff]   ;;  %s291_s20 = scalar_select %p290_p10, %s1918_s17, 24 }
  0x14   : > { %1464 = vmatprep.subr.bf16.mxu0 %v1816_v1  ;;  %1592 = vmatprep.subr.bf16.mxu1 %v1816_v1  ;;  %v1650_v4 = vld [vmem:[%s2301_s1 + $0x10] sm:$0xff]   ;;  %v1651_v5 = vld [vmem:[%s2301_s1 + $0x8] sm:$0xff]   ;;  %v1652_v6 = vld [vmem:[%s2301_s1] sm:$0xff]   ;;  %vm406_vm1 = vcmask 785408  }
  0x15   : > { %1465 = vmatpush3.bf16.msra.mxu0 %v1647_v0  ;;  %1598 = vmatpush3.bf16.msra.mxu1 %v1647_v0  ;;  %s1273_s21 = sshll.u32 %s291_s20, 2  ;;  %v1660_v14 = vld [vmem:[%s2303_s3 + $0x38] sm:$0xff]   ;;  %v1661_v15 = vld [vmem:[%s2303_s3 + $0x30] sm:$0xff]   ;;  %v1662_v16 = vld [vmem:[%s2303_s3 + $0x28] sm:$0xff]   ;;  %s2240_s20 = scalar_lea.sflag [#allocation3], %s282_s14 }
  0x16   : > { %1466 = vmatprep.subr.bf16.mxu0 %v1816_v1  ;;  %1593 = vmatprep.subr.bf16.mxu1 %v1816_v1  ;;  %s1936_s29 = scalar_lea.vmem %s2300_s0, %s1273_s21  ;;  %v1663_v17 = vld [vmem:[%s2303_s3 + $0x20] sm:$0xff]   ;;  %v1664_v18 = vld [vmem:[%s2303_s3 + $0x18] sm:$0xff]   ;;  %v1665_v19 = vld [vmem:[%s2303_s3 + $0x10] sm:$0xff]   ;;  %s1196_s21 = ssub.s32 (%p1899_p5), 25, %s1918_s17 }
  0x17   : > { %1476 = vmatprep.mubr.msk.bf16.mxu0 %vm1817_vm0, %v1816_v1  ;;  %1492 = vmatprep.mubr.msk.bf16.mxu1 %vm1817_vm0, %v1816_v1  ;;  %v1653_v7 = vld [vmem:[%s1936_s29] sm:$0xff]   ;;  %v1654_v9 = vld [vmem:[%s1936_s29 + $0x8] sm:$0xff]   ;;  %v1656_v11 = vld [vmem:[%s1936_s29 + $0x10] sm:$0xff]   ;;  %p1197_p11 = scmp.lt.s32.totalorder (%p1899_p5), %s1196_s21, 13 }
  0x18   : > { %v1655_v8 = vld [vmem:[%s1936_s29 + $0x20] sm:$0xff]   ;;  %v1657_v10 = vld [vmem:[%s1936_s29 + $0x28] sm:$0xff]   ;;  %v1659_v12 = vld [vmem:[%s1936_s29 + $0x30] ss:$0 sps:$4 sm:$0xff]  }
  0x19   : > { %1467 = vmatpush3.bf16.msra.mxu0 %v1648_v2  ;;  %1599 = vmatpush3.bf16.msra.mxu1 %v1648_v2  ;;  %v1658_v13 = vld [vmem:[%s1936_s29 + $0x18] sm:$0xff]   ;;  %v1666_v20 = vld [vmem:[%s2303_s3 + $0x8] sm:$0xff]   ;;  %v1667_v21 = vld [vmem:[%s2303_s3] sm:$0xff]  }
  0x1a   : > { %1468 = vmatprep.subr.bf16.mxu0 %v1816_v1  ;;  %1594 = vmatprep.subr.bf16.mxu1 %v1816_v1  ;;  %v2017_v22 = vld [vmem:[%s2302_s2] ss:$0 sm:$0xff] }
  0x1d   : > { %1469 = vmatpush3.bf16.msra.mxu0 %v1649_v3  ;;  %1600 = vmatpush3.bf16.msra.mxu1 %v1649_v3 }
  0x1e   : > { %1470 = vmatprep.subr.bf16.mxu0 %v1816_v1  ;;  %1595 = vmatprep.subr.bf16.mxu1 %v1816_v1 }
  0x21   : > { %1471 = vmatpush3.bf16.msra.mxu0 %v1650_v4  ;;  %1601 = vmatpush3.bf16.msra.mxu1 %v1650_v4 }
  0x22   : > { %1472 = vmatprep.subr.bf16.mxu0 %v1816_v1  ;;  %1596 = vmatprep.subr.bf16.mxu1 %v1816_v1 }
  0x25   : > { %1473 = vmatpush3.bf16.msra.mxu0 %v1651_v5  ;;  %1602 = vmatpush3.bf16.msra.mxu1 %v1651_v5 }
  0x26   : > { %1474 = vmatprep.subr.bf16.mxu0 %v1816_v1  ;;  %1597 = vmatprep.subr.bf16.mxu1 %v1816_v1 }
  0x29   : > { %1475 = vmatpush3.bf16.msra.mxu0 %v1652_v6  ;;  %1603 = vmatpush3.bf16.msra.mxu1 %v1652_v6 }
  0x2a   : > { %1504 = vmatprep.subr.bf16.mxu1 %v1816_v1  ;;  %1548 = vmatprep.subr.bf16.mxu0 %v1816_v1 }
  0x2c   : > { %1477 = vmatmul.mubr.msk.bf16.vlgmr.msra.gmra.mxu0 %vm406_vm1, %v1653_v7  ;;  %1493 = vmatmul.mubr.msk.bf16.vlgmr.msra.gmra.mxu1 %vm406_vm1, %v1655_v8 }
  0x2d   : > { %1480 = vmatprep.mubr.msk.bf16.mxu0 %vm1817_vm0, %v1816_v1  ;;  %1496 = vmatprep.mubr.msk.bf16.mxu1 %vm1817_vm0, %v1816_v1 }
  0x2e   : > { %1505 = vmatpush3.bf16.msra.mxu1 %v1660_v14 }
  0x2f   : > { %1506 = vmatprep.subr.bf16.mxu1 %v1816_v1 }
  0x32   : > { %1507 = vmatpush3.bf16.msra.mxu1 %v1661_v15 }
  0x33   : > { %1508 = vmatprep.subr.bf16.mxu1 %v1816_v1 }
  0x34   : > { %1481 = vmatmul.mubr.msk.bf16.gmra.mxu0 %vm406_vm1, %v1654_v9  ;;  %1497 = vmatmul.mubr.msk.bf16.gmra.mxu1 %vm406_vm1, %v1657_v10 }
  0x35   : > { %1484 = vmatprep.mubr.msk.bf16.mxu0 %vm1817_vm0, %v1816_v1  ;;  %1500 = vmatprep.mubr.msk.bf16.mxu1 %vm1817_vm0, %v1816_v1 }
  0x36   : > { %1509 = vmatpush3.bf16.msra.mxu1 %v1662_v16 }
  0x37   : > { %1510 = vmatprep.subr.bf16.mxu1 %v1816_v1 }
  0x3a   : > { %1511 = vmatpush3.bf16.msra.mxu1 %v1663_v17 }
  0x3b   : > { %1512 = vmatprep.subr.bf16.mxu1 %v1816_v1 }
  0x3c   : > { %1485 = vmatmul.mubr.msk.bf16.gmra.mxu0 %vm406_vm1, %v1656_v11  ;;  %1501 = vmatmul.mubr.msk.bf16.gmra.mxu1 %vm406_vm1, %v1659_v12 }
  0x3d   : > { %1488 = vmatprep.mubr.msk.bf16.mxu0 %vm1817_vm0, %v1816_v1  ;;  %1520 = vmatprep.mubr.msk.bf16.mxu1 %vm1817_vm0, %v1816_v1 }
  0x3e   : > { %1513 = vmatpush3.bf16.msra.mxu1 %v1664_v18 }
  0x3f   : > { %1514 = vmatprep.subr.bf16.mxu1 %v1816_v1 }
  0x42   : > { %1515 = vmatpush3.bf16.msra.mxu1 %v1665_v19 }
  0x43   : > { %1516 = vmatprep.subr.bf16.mxu1 %v1816_v1 }
  0x44   : > { %1489 = vmatmul.mubr.msk.bf16.gmra.mxu0 %vm406_vm1, %v1658_v13 }
  0x45   : > { %1564 = vmatprep.mubr.msk.bf16.mxu0 %vm1817_vm0, %v1816_v1 }
  0x46   : > { %1517 = vmatpush3.bf16.msra.mxu1 %v1666_v20 }
  0x47   : > { %1518 = vmatprep.subr.bf16.mxu1 %v1816_v1 }
  0x4a   : > { %1519 = vmatpush3.bf16.msra.mxu1 %v1667_v21 }
  0xec   : > { %v462_v23 = vpop.f32.mrf.mxu0  ;;  %v494_v24 = vpop.f32.mrf.mxu1 }
  0xed   : > { %v463_v25 = vadd.f32 %v2017_v22, %v462_v23  ;;  %v2039_v60 = vadd.f32 %v2017_v22, %v494_v24 }
  0xee   : > { %v1478_v26 = vpop.f32.mrf.mxu0  ;;  %v1494_v27 = vpop.f32.mrf.mxu1 }
  0xef   : > { %v529_v28 = vmul.f32 1.442695, %v463_v25  ;;  %vm516_vm2 = vcmp.gt.f32.partialorder %v463_v25, 0.0  ;;  %v545_v8 = vmul.f32 1.442695, %v2039_v60  ;;  %vm524_vm10 = vcmp.gt.f32.partialorder %v2039_v60, 0.0 }
  0xf0   : > { %v465_v29 = vpop.f32.mrf.mxu0  ;;  %v497_v30 = vpop.f32.mrf.mxu1 }
  0xf1   : > { %1676 = vpow2.f32 %v529_v28  ;;  %v466_v31 = vadd.f32 %v2017_v22, %v465_v29  ;;  %v2042_v0 = vadd.f32 %v2017_v22, %v497_v30 }
  0xf2   : > { %v1479_v32 = vpop.f32.mrf.mxu0  ;;  %v1495_v33 = vpop.f32.mrf.mxu1 }
  0xf3   : > { %v531_v34 = vmul.f32 1.442695, %v466_v31  ;;  %vm517_vm3 = vcmp.gt.f32.partialorder %v466_v31, 0.0  ;;  %v547_v12 = vmul.f32 1.442695, %v2042_v0  ;;  %vm525_vm11 = vcmp.gt.f32.partialorder %v2042_v0, 0.0 }
  0xf4   : > { %v470_v35 = vpop.f32.mrf.mxu0  ;;  %v502_v36 = vpop.f32.mrf.mxu1 }
  0xf5   : > { %1678 = vpow2.f32 %v531_v34  ;;  %v2022_v37 = vadd.f32 %v2017_v22, %v470_v35  ;;  %v2053_v21 = vadd.f32 %v2017_v22, %v502_v36 }
  0xf6   : > { %v1482_v38 = vpop.f32.mrf.mxu0  ;;  %v1498_v39 = vpop.f32.mrf.mxu1 }
  0xf7   : > { %v533_v40 = vmul.f32 1.442695, %v2022_v37  ;;  %vm518_vm4 = vcmp.gt.f32.partialorder %v2022_v37, 0.0  ;;  %v549_v30 = vmul.f32 1.442695, %v2053_v21  ;;  %vm526_vm12 = vcmp.gt.f32.partialorder %v2053_v21, 0.0 }
  0xf8   : > { %v473_v41 = vpop.f32.mrf.mxu0  ;;  %v505_v42 = vpop.f32.mrf.mxu1 }
  0xf9   : > { %1680 = vpow2.f32 %v533_v40  ;;  %v2026_v43 = vadd.f32 %v2017_v22, %v473_v41 }
  0xfa   : > { %v1483_v44 = vpop.f32.mrf.mxu0  ;;  %v1499_v45 = vpop.f32.mrf.mxu1 }
  0xfb   : > { %v535_v46 = vmul.f32 1.442695, %v2026_v43  ;;  %vm519_vm5 = vcmp.gt.f32.partialorder %v2026_v43, 0.0 }
  0xfc   : > { %v478_v47 = vpop.f32.mrf.mxu0  ;;  %v2029_v48 = vpop.f32.mrf.mxu1 }
  0xfd   : > { %1682 = vpow2.f32 %v535_v46  ;;  %v2032_v49 = vadd.f32 %v2017_v22, %v478_v47  ;;  %v2068_v40 = vadd.f32 %v2017_v22, %v2029_v48 }
  0xfe   : > { %v1677_v50 = vpop.eup %1676  ;;  %v1486_v51 = vpop.f32.mrf.mxu0 }
  0xff   : > { %v1502_v52 = vpop.f32.mrf.mxu1  ;;  %v1295_v53 = vadd.f32 -1.0, %v1677_v50  ;;  %v537_v54 = vmul.f32 1.442695, %v2032_v49  ;;  %vm520_vm6 = vcmp.gt.f32.partialorder %v2032_v49, 0.0  ;;  %v553_v47 = vmul.f32 1.442695, %v2068_v40 }
 0x100   : > { %v481_v55 = vpop.f32.mrf.mxu0  ;;  %vm528_vm14 = vcmp.gt.f32.partialorder %v2068_v40, 0.0 }
 0x101   : > { %v513_v56 = vpop.f32.mrf.mxu1  ;;  %v568_v57 = vmul.f32 1.6732632, %v1295_v53  ;;  %1684 = vpow2.f32 %v537_v54  ;;  %v2036_v58 = vadd.f32 %v2017_v22, %v481_v55 }
 0x102   : > { %v1679_v59 = vpop.eup %1678  ;;  %v1487_v61 = vpop.f32.mrf.mxu0 }
 0x103   : > { %v1503_v62 = vpop.f32.mrf.mxu1  ;;  %v1296_v63 = vadd.f32 -1.0, %v1679_v59  ;;  %v539_v2 = vmul.f32 1.442695, %v2036_v58  ;;  %v581_v4 = vsel %vm516_vm2, %v463_v25, %v568_v57  ;;  %v2056_v25 = vadd.f32 %v2017_v22, %v505_v42 }
 0x104   : > { %v486_v3 = vpop.f32.mrf.mxu0  ;;  %v594_v14 = vmul.f32 1.050701, %v581_v4  ;;  %vm521_vm7 = vcmp.gt.f32.partialorder %v2036_v58, 0.0 }
 0x105   : > { %v569_v5 = vmul.f32 1.6732632, %v1296_v63  ;;  %1686 = vpow2.f32 %v539_v2  ;;  %v2046_v6 = vadd.f32 %v2017_v22, %v486_v3  ;;  %v551_v33 = vmul.f32 1.442695, %v2056_v25 }
 0x106   : > { %v1681_v7 = vpop.eup %1680  ;;  %v1490_v9 = vpop.f32.mrf.mxu0  ;;  %vm527_vm13 = vcmp.gt.f32.partialorder %v2056_v25, 0.0 }
 0x107   : > { %v582_v10 = vsel %vm517_vm3, %v466_v31, %v569_v5  ;;  %v1297_v11 = vadd.f32 -1.0, %v1681_v7  ;;  %v541_v13 = vmul.f32 1.442695, %v2046_v6  ;;  %vm522_vm8 = vcmp.gt.f32.partialorder %v2046_v6, 0.0 }
 0x108   : > { %v595_v15 = vmul.f32 1.050701, %v582_v10  ;;  %v489_v16 = vpop.f32.mrf.mxu0 }
 0x109   : > { %v570_v17 = vmul.f32 1.6732632, %v1297_v11  ;;  %1688 = vpow2.f32 %v541_v13  ;;  %v490_v18 = vadd.f32 %v2017_v22, %v489_v16 }
 0x10a   : > { %v1683_v19 = vpop.eup %1682  ;;  %v607_v20 = vpack.c.bf16 %v595_v15, %v594_v14  ;;  %1690 = vpow2.f32 %v545_v8  ;;  %v1491_v23 = vpop.f32.mrf.mxu0 }
 0x10b   : > { %v1298_v24 = vadd.f32 -1.0, %v1683_v19  ;;  %1692 = vpow2.f32 %v547_v12  ;;  %v543_v26 = vmul.f32 1.442695, %v490_v18  ;;  %v583_v27 = vsel %vm518_vm4, %v2022_v37, %v570_v17 }
 0x10c   : > { %1521 = vmatmul.mubr.bf16.vlgmr.msra.gmra.mxu1 %v607_v20  ;;  %v596_v34 = vmul.f32 1.050701, %v583_v27  ;;  %vm523_vm9 = vcmp.gt.f32.partialorder %v490_v18, 0.0  ;;  %v1671_v27 = vld [vmem:[%s2305_s5 + $0x20] sm:$0xff]  }
 0x10d   : > { %v571_v28 = vmul.f32 1.6732632, %v1298_v24  ;;  %1694 = vpow2.f32 %v543_v26  ;;  %1524 = vmatprep.mubr.msk.bf16.mxu1 %vm1817_vm0, %v1816_v1  ;;  %v1668_v24 = vld [vmem:[%s2305_s5 + $0x38] sm:$0xff]   ;;  %v1670_v26 = vld [vmem:[%s2305_s5 + $0x28] sm:$0xff]  }
 0x10e   : > { %v1685_v29 = vpop.eup %1684  ;;  %1696 = vpow2.f32 %v549_v30  ;;  %1549 = vmatpush3.bf16.msra.mxu0 %v1668_v24  ;;  %v1674_v30 = vld [vmem:[%s2305_s5 + $0x8] sm:$0xff]  }
 0x10f   : > { %v584_v31 = vsel %vm519_vm5, %v2026_v43, %v571_v28  ;;  %v1299_v32 = vadd.f32 -1.0, %v1685_v29  ;;  %1698 = vpow2.f32 %v551_v33  ;;  %1550 = vmatprep.subr.bf16.mxu0 %v1816_v1  ;;  %v1672_v28 = vld [vmem:[%s2305_s5 + $0x18] sm:$0xff]   ;;  %v1673_v29 = vld [vmem:[%s2305_s5 + $0x10] sm:$0xff]  }
 0x110   : > { %v597_v35 = vmul.f32 1.050701, %v584_v31  ;;  %1700 = vpow2.f32 %v553_v47  ;;  %v1675_v31 = vld [vmem:[%s2305_s5] sm:$0xff]  }
 0x111   : > { %v572_v36 = vmul.f32 1.6732632, %v1299_v32  ;;  %v2131_v32 = vld [vmem:[%s2304_s4] ss:$0 sm:$0xff] }
 0x112   : > { %v1687_v38 = vpop.eup %1686  ;;  %v608_v37 = vpack.c.bf16 %v597_v35, %v596_v34 }
 0x113   : > { %v1300_v39 = vadd.f32 -1.0, %v1687_v38  ;;  %v585_v41 = vsel %vm520_vm6, %v2032_v49, %v572_v36 }
 0x114   : > { %1525 = vmatmul.mubr.bf16.gmra.mxu1 %v608_v37  ;;  %v598_v48 = vmul.f32 1.050701, %v585_v41 }
 0x115   : > { %v573_v42 = vmul.f32 1.6732632, %v1300_v39  ;;  %1528 = vmatprep.mubr.msk.bf16.mxu1 %vm1817_vm0, %v1816_v1 }
 0x116   : > { %v1689_v43 = vpop.eup %1688 }
 0x117   : > { %v1691_v44 = vpop.eup %1690  ;;  %v586_v45 = vsel %vm521_vm7, %v2036_v58, %v573_v42  ;;  %v1301_v46 = vadd.f32 -1.0, %v1689_v43 }
 0x118   : > { %v1693_v22 = vpop.eup %1692  ;;  %v599_v50 = vmul.f32 1.050701, %v586_v45  ;;  %v1303_v49 = vadd.f32 -1.0, %v1691_v44 }
 0x119   : > { %v574_v51 = vmul.f32 1.6732632, %v1301_v46  ;;  %v1304_v54 = vadd.f32 -1.0, %v1693_v22 }
 0x11a   : > { %v1695_v52 = vpop.eup %1694  ;;  %v609_v53 = vpack.c.bf16 %v599_v50, %v598_v48  ;;  %v576_v59 = vmul.f32 1.6732632, %v1303_v49 }
 0x11b   : > { %v1302_v55 = vadd.f32 -1.0, %v1695_v52  ;;  %v587_v56 = vsel %vm522_vm8, %v2046_v6, %v574_v51  ;;  %v1697_v58 = vpop.eup %1696  ;;  %v577_v61 = vmul.f32 1.6732632, %v1304_v54 }
 0x11c   : > { %1529 = vmatmul.mubr.bf16.gmra.mxu1 %v609_v53  ;;  %v1699_v63 = vpop.eup %1698  ;;  %v600_v2 = vmul.f32 1.050701, %v587_v56  ;;  %v589_v5 = vsel %vm524_vm10, %v2039_v60, %v576_v59  ;;  %v1305_v7 = vadd.f32 -1.0, %v1697_v58 }
 0x11d   : > { %v575_v57 = vmul.f32 1.6732632, %v1302_v55  ;;  %1532 = vmatprep.mubr.msk.bf16.mxu1 %vm1817_vm0, %v1816_v1  ;;  %v590_v6 = vsel %vm525_vm11, %v2042_v0, %v577_v61  ;;  %v1306_v8 = vadd.f32 -1.0, %v1699_v63  ;;  %v602_v9 = vmul.f32 1.050701, %v589_v5  ;;  %v1701_v13 = vpop.eup %1700 }
 0x11e   : > { %v603_v10 = vmul.f32 1.050701, %v590_v6  ;;  %v578_v11 = vmul.f32 1.6732632, %v1305_v7  ;;  %v1307_v15 = vadd.f32 -1.0, %v1701_v13 }
 0x11f   : > { %v588_v62 = vsel %vm523_vm9, %v490_v18, %v575_v57  ;;  %v579_v12 = vmul.f32 1.6732632, %v1306_v8 }
 0x120   : > { %v601_v3 = vmul.f32 1.050701, %v588_v62  ;;  %v611_v14 = vpack.c.bf16 %v603_v10, %v602_v9  ;;  %v591_v60 = vsel %vm526_vm12, %v2053_v21, %v578_v11  ;;  %v580_v18 = vmul.f32 1.6732632, %v1307_v15 }
 0x121   : > { %v592_v0 = vsel %vm527_vm13, %v2056_v25, %v579_v12  ;;  %v604_v16 = vmul.f32 1.050701, %v591_v60  ;;  %v1669_v25 = vld [vmem:[%s2305_s5 + $0x30] sm:$0xff]  }
 0x122   : > { %v610_v4 = vpack.c.bf16 %v601_v3, %v600_v2  ;;  %v605_v17 = vmul.f32 1.050701, %v592_v0  ;;  %v593_v20 = vsel %vm528_vm14, %v2068_v40, %v580_v18  ;;  %1551 = vmatpush3.bf16.msra.mxu0 %v1669_v25 }
 0x123   : > { %v606_v21 = vmul.f32 1.050701, %v593_v20  ;;  %1552 = vmatprep.subr.bf16.mxu0 %v1816_v1 }
 0x124   : > { %1533 = vmatmul.mubr.bf16.gmra.mxu1 %v610_v4  ;;  %v612_v19 = vpack.c.bf16 %v605_v17, %v604_v16 }
 0x125   : > { %1536 = vmatprep.mubr.msk.bf16.mxu1 %vm1817_vm0, %v1816_v1  ;;  %v613_v23 = vpack.c.bf16 %v606_v21, %v606_v21 }
 0x126   : > { %1553 = vmatpush3.bf16.msra.mxu0 %v1670_v26 }
 0x127   : > { %1554 = vmatprep.subr.bf16.mxu0 %v1816_v1 }
 0x12a   : > { %1555 = vmatpush3.bf16.msra.mxu0 %v1671_v27 }
 0x12b   : > { %1556 = vmatprep.subr.bf16.mxu0 %v1816_v1 }
 0x12c   : > { %1537 = vmatmul.mubr.bf16.gmra.mxu1 %v611_v14 }
 0x12d   : > { %1540 = vmatprep.mubr.msk.bf16.mxu1 %vm1817_vm0, %v1816_v1 }
 0x12e   : > { %1557 = vmatpush3.bf16.msra.mxu0 %v1672_v28 }
 0x12f   : > { %1558 = vmatprep.subr.bf16.mxu0 %v1816_v1 }
 0x132   : > { %1559 = vmatpush3.bf16.msra.mxu0 %v1673_v29 }
 0x133   : > { %1560 = vmatprep.subr.bf16.mxu0 %v1816_v1 }
 0x134   : > { %1541 = vmatmul.mubr.bf16.gmra.mxu1 %v612_v19 }
 0x135   : > { %1544 = vmatprep.mubr.msk.bf16.mxu1 %vm1817_vm0, %v1816_v1 }
 0x136   : > { %1561 = vmatpush3.bf16.msra.mxu0 %v1674_v30 }
 0x137   : > { %1562 = vmatprep.subr.bf16.mxu0 %v1816_v1 }
 0x13a   : > { %1563 = vmatpush3.bf16.msra.mxu0 %v1675_v31 }
 0x13c   : > { %1545 = vmatmul.mubr.bf16.gmra.mxu1 %v613_v23 }
 0x1cc   : > { %v719_v33 = vpop.f32.mrf.mxu1 }
 0x1cd   : > { %v720_v34 = vadd.f32 %v2131_v32, %v719_v33 }
 0x1ce   : > { %v1522_v35 = vpop.f32.mrf.mxu1 }
 0x1cf   : > { %v786_v36 = vmul.f32 1.442695, %v720_v34  ;;  %vm773_vm15 = vcmp.gt.f32.partialorder %v720_v34, 0.0 }
 0x1d0   : > { %v722_v38 = vpop.f32.mrf.mxu1 }
 0x1d1   : > { %1702 = vpow2.f32 %v786_v36  ;;  %v723_v37 = vadd.f32 %v2131_v32, %v722_v38 }
 0x1d2   : > { %v1523_v39 = vpop.f32.mrf.mxu1 }
 0x1d3   : > { %v788_v40 = vmul.f32 1.442695, %v723_v37  ;;  %vm774_vm1 = vcmp.gt.f32.partialorder %v723_v37, 0.0 }
 0x1d4   : > { %v727_v41 = vpop.f32.mrf.mxu1 }
 0x1d5   : > { %1704 = vpow2.f32 %v788_v40  ;;  %v728_v42 = vadd.f32 %v2131_v32, %v727_v41 }
 0x1d6   : > { %v1526_v43 = vpop.f32.mrf.mxu1 }
 0x1d7   : > { %v790_v44 = vmul.f32 1.442695, %v728_v42  ;;  %vm775_vm2 = vcmp.gt.f32.partialorder %v728_v42, 0.0 }
 0x1d8   : > { %v730_v45 = vpop.f32.mrf.mxu1 }
 0x1d9   : > { %1706 = vpow2.f32 %v790_v44  ;;  %v731_v46 = vadd.f32 %v2131_v32, %v730_v45 }
 0x1da   : > { %v1527_v47 = vpop.f32.mrf.mxu1 }
 0x1db   : > { %v792_v22 = vmul.f32 1.442695, %v731_v46  ;;  %vm776_vm3 = vcmp.gt.f32.partialorder %v731_v46, 0.0 }
 0x1dc   : > { %v735_v48 = vpop.f32.mrf.mxu1 }
 0x1dd   : > { %1708 = vpow2.f32 %v792_v22  ;;  %v2138_v50 = vadd.f32 %v2131_v32, %v735_v48 }
 0x1de   : > { %v1703_v51 = vpop.eup %1702  ;;  %v1530_v52 = vpop.f32.mrf.mxu1 }
 0x1df   : > { %v1317_v53 = vadd.f32 -1.0, %v1703_v51  ;;  %v794_v49 = vmul.f32 1.442695, %v2138_v50  ;;  %vm777_vm4 = vcmp.gt.f32.partialorder %v2138_v50, 0.0 }
 0x1e0   : > { %v738_v54 = vpop.f32.mrf.mxu1 }
 0x1e1   : > { %v825_v55 = vmul.f32 1.6732632, %v1317_v53  ;;  %1710 = vpow2.f32 %v794_v49  ;;  %v2142_v56 = vadd.f32 %v2131_v32, %v738_v54 }
 0x1e2   : > { %v1705_v57 = vpop.eup %1704  ;;  %v1531_v58 = vpop.f32.mrf.mxu1 }
 0x1e3   : > { %v1318_v59 = vadd.f32 -1.0, %v1705_v57  ;;  %v796_v61 = vmul.f32 1.442695, %v2142_v56  ;;  %v838_v63 = vsel %vm773_vm15, %v720_v34, %v825_v55  ;;  %vm778_vm5 = vcmp.gt.f32.partialorder %v2142_v56, 0.0 }
 0x1e4   : > { %v743_v62 = vpop.f32.mrf.mxu1  ;;  %v851_v9 = vmul.f32 1.050701, %v838_v63 }
 0x1e5   : > { %v826_v2 = vmul.f32 1.6732632, %v1318_v59  ;;  %1712 = vpow2.f32 %v796_v61  ;;  %v2146_v3 = vadd.f32 %v2131_v32, %v743_v62 }
 0x1e6   : > { %v1707_v4 = vpop.eup %1706  ;;  %v1534_v5 = vpop.f32.mrf.mxu1 }
 0x1e7   : > { %v839_v6 = vsel %vm774_vm1, %v723_v37, %v826_v2  ;;  %v1319_v7 = vadd.f32 -1.0, %v1707_v4  ;;  %v798_v8 = vmul.f32 1.442695, %v2146_v3  ;;  %vm779_vm6 = vcmp.gt.f32.partialorder %v2146_v3, 0.0 }
 0x1e8   : > { %v852_v10 = vmul.f32 1.050701, %v839_v6  ;;  %v746_v11 = vpop.f32.mrf.mxu1 }
 0x1e9   : > { %v827_v12 = vmul.f32 1.6732632, %v1319_v7  ;;  %1714 = vpow2.f32 %v798_v8  ;;  %v2150_v13 = vadd.f32 %v2131_v32, %v746_v11 }
 0x1ea   : > { %v1709_v14 = vpop.eup %1708  ;;  %v864_v60 = vpack.c.bf16 %v852_v10, %v851_v9  ;;  %v1535_v0 = vpop.f32.mrf.mxu1 }
 0x1eb   : > { %v1320_v15 = vadd.f32 -1.0, %v1709_v14  ;;  %v800_v16 = vmul.f32 1.442695, %v2150_v13  ;;  %v840_v18 = vsel %vm775_vm2, %v728_v42, %v827_v12  ;;  %vm780_vm7 = vcmp.gt.f32.partialorder %v2150_v13, 0.0 }
 0x1ec   : > { %v751_v17 = vpop.f32.mrf.mxu1  ;;  %1565 = vmatmul.mubr.bf16.vlgmr.msra.gmra.mxu0 %v864_v60  ;;  %v853_v27 = vmul.f32 1.050701, %v840_v18 }
 0x1ed   : > { %v828_v19 = vmul.f32 1.6732632, %v1320_v15  ;;  %1716 = vpow2.f32 %v800_v16  ;;  %v2154_v20 = vadd.f32 %v2131_v32, %v751_v17  ;;  %1568 = vmatprep.mubr.msk.bf16.mxu0 %vm1817_vm0, %v1816_v1 }
 0x1ee   : > { %v1711_v21 = vpop.eup %1710  ;;  %v1538_v23 = vpop.f32.mrf.mxu1 }
 0x1ef   : > { %v841_v24 = vsel %vm776_vm3, %v731_v46, %v828_v19  ;;  %v1321_v25 = vadd.f32 -1.0, %v1711_v21  ;;  %v802_v26 = vmul.f32 1.442695, %v2154_v20  ;;  %vm781_vm8 = vcmp.gt.f32.partialorder %v2154_v20, 0.0 }
 0x1f0   : > { %v854_v28 = vmul.f32 1.050701, %v841_v24  ;;  %v754_v29 = vpop.f32.mrf.mxu1 }
 0x1f1   : > { %v829_v30 = vmul.f32 1.6732632, %v1321_v25  ;;  %1718 = vpow2.f32 %v802_v26  ;;  %v755_v31 = vadd.f32 %v2131_v32, %v754_v29 }
 0x1f2   : > { %v1713_v33 = vpop.eup %1712  ;;  %v1539_v34 = vpop.f32.mrf.mxu1  ;;  %v865_v35 = vpack.c.bf16 %v854_v28, %v853_v27 }
 0x1f3   : > { %v1322_v36 = vadd.f32 -1.0, %v1713_v33  ;;  %v804_v38 = vmul.f32 1.442695, %v755_v31  ;;  %v842_v39 = vsel %vm777_vm4, %v2138_v50, %v829_v30  ;;  %vm782_vm9 = vcmp.gt.f32.partialorder %v755_v31, 0.0  ;;  %v2187_v34 = vld [vmem:[%s2306_s6] ss:$0 sm:$0xff] }
 0x1f4   : > { %v759_v37 = vpop.f32.mrf.mxu1  ;;  %1569 = vmatmul.mubr.bf16.gmra.mxu0 %v865_v35  ;;  %v855_v47 = vmul.f32 1.050701, %v842_v39 }
 0x1f5   : > { %v830_v40 = vmul.f32 1.6732632, %v1322_v36  ;;  %1720 = vpow2.f32 %v804_v38  ;;  %v760_v41 = vadd.f32 %v2131_v32, %v759_v37  ;;  %1572 = vmatprep.mubr.msk.bf16.mxu0 %vm1817_vm0, %v1816_v1 }
 0x1f6   : > { %v1715_v42 = vpop.eup %1714  ;;  %v1542_v43 = vpop.f32.mrf.mxu1 }
 0x1f7   : > { %v843_v44 = vsel %vm778_vm5, %v2142_v56, %v830_v40  ;;  %v1323_v45 = vadd.f32 -1.0, %v1715_v42  ;;  %v806_v46 = vmul.f32 1.442695, %v760_v41  ;;  %vm783_vm10 = vcmp.gt.f32.partialorder %v760_v41, 0.0 }
 0x1f8   : > { %v856_v22 = vmul.f32 1.050701, %v843_v44  ;;  %v762_v48 = vpop.f32.mrf.mxu1 }
 0x1f9   : > { %v831_v51 = vmul.f32 1.6732632, %v1323_v45  ;;  %1722 = vpow2.f32 %v806_v46  ;;  %v763_v50 = vadd.f32 %v2131_v32, %v762_v48 }
 0x1fa   : > { %v1717_v52 = vpop.eup %1716  ;;  %v1543_v53 = vpop.f32.mrf.mxu1  ;;  %v866_v49 = vpack.c.bf16 %v856_v22, %v855_v47 }
 0x1fb   : > { %v1324_v54 = vadd.f32 -1.0, %v1717_v52  ;;  %v808_v55 = vmul.f32 1.442695, %v763_v50  ;;  %v844_v56 = vsel %vm779_vm6, %v2146_v3, %v831_v51  ;;  %vm784_vm11 = vcmp.gt.f32.partialorder %v763_v50, 0.0 }
 0x1fc   : > { %v767_v57 = vpop.f32.mrf.mxu1  ;;  %1573 = vmatmul.mubr.bf16.gmra.mxu0 %v866_v49  ;;  %v857_v5 = vmul.f32 1.050701, %v844_v56 }
 0x1fd   : > { %v832_v58 = vmul.f32 1.6732632, %v1324_v54  ;;  %1724 = vpow2.f32 %v808_v55  ;;  %v768_v59 = vadd.f32 %v2131_v32, %v767_v57  ;;  %1576 = vmatprep.mubr.msk.bf16.mxu0 %vm1817_vm0, %v1816_v1 }
 0x1fe   : > { %v1719_v61 = vpop.eup %1718  ;;  %v1546_v62 = vpop.f32.mrf.mxu1 }
 0x1ff   : > { %v845_v63 = vsel %vm780_vm7, %v2150_v13, %v832_v58  ;;  %v1325_v2 = vadd.f32 -1.0, %v1719_v61  ;;  %v810_v4 = vmul.f32 1.442695, %v768_v59  ;;  %vm785_vm12 = vcmp.gt.f32.partialorder %v768_v59, 0.0 }
 0x200   : > { %v858_v6 = vmul.f32 1.050701, %v845_v63  ;;  %v770_v7 = vpop.f32.mrf.mxu1 }
 0x201   : > { %v833_v8 = vmul.f32 1.6732632, %v1325_v2  ;;  %1726 = vpow2.f32 %v810_v4 }
 0x202   : > { %v1721_v3 = vpop.eup %1720  ;;  %v1547_v9 = vpop.f32.mrf.mxu1  ;;  %v867_v10 = vpack.c.bf16 %v858_v6, %v857_v5 }
 0x203   : > { %v1326_v32 = vadd.f32 -1.0, %v1721_v3  ;;  %v846_v11 = vsel %vm781_vm8, %v2154_v20, %v833_v8 }
 0x204   : > { %1577 = vmatmul.mubr.bf16.gmra.mxu0 %v867_v10  ;;  %v859_v0 = vmul.f32 1.050701, %v846_v11 }
 0x205   : > { %v834_v12 = vmul.f32 1.6732632, %v1326_v32  ;;  %1580 = vmatprep.mubr.msk.bf16.mxu0 %vm1817_vm0, %v1816_v1 }
 0x206   : > { %v1723_v13 = vpop.eup %1722 }
 0x207   : > { %v847_v14 = vsel %vm782_vm9, %v755_v31, %v834_v12  ;;  %v1327_v60 = vadd.f32 -1.0, %v1723_v13 }
 0x208   : > { %v860_v15 = vmul.f32 1.050701, %v847_v14 }
 0x209   : > { %v835_v16 = vmul.f32 1.6732632, %v1327_v60 }
 0x20a   : > { %v1725_v17 = vpop.eup %1724  ;;  %v868_v18 = vpack.c.bf16 %v860_v15, %v859_v0 }
 0x20b   : > { %v1328_v19 = vadd.f32 -1.0, %v1725_v17  ;;  %v848_v21 = vsel %vm783_vm10, %v760_v41, %v835_v16 }
 0x20c   : > { %1581 = vmatmul.mubr.bf16.gmra.mxu0 %v868_v18  ;;  %v861_v26 = vmul.f32 1.050701, %v848_v21 }
 0x20d   : > { %v836_v23 = vmul.f32 1.6732632, %v1328_v19  ;;  %1584 = vmatprep.mubr.msk.bf16.mxu0 %vm1817_vm0, %v1816_v1 }
 0x20e   : > { %v1727_v20 = vpop.eup %1726 }
 0x20f   : > { %v849_v24 = vsel %vm784_vm11, %v763_v50, %v836_v23  ;;  %v1329_v25 = vadd.f32 -1.0, %v1727_v20 }
 0x210   : > { %v862_v27 = vmul.f32 1.050701, %v849_v24 }
 0x211   : > { %v837_v28 = vmul.f32 1.6732632, %v1329_v25 }
 0x212   : > { %v869_v29 = vpack.c.bf16 %v862_v27, %v861_v26 }
 0x213   : > { %v850_v30 = vsel %vm785_vm12, %v768_v59, %v837_v28 }
 0x214   : > { %1585 = vmatmul.mubr.bf16.gmra.mxu0 %v869_v29  ;;  %v863_v31 = vmul.f32 1.050701, %v850_v30 }
 0x215   : > { %1588 = vmatprep.mubr.msk.bf16.mxu0 %vm1817_vm0, %v1816_v1 }
 0x216   : > { %v870_v33 = vpack.c.bf16 %v863_v31, %v863_v31 }
 0x21c   : > { %1589 = vmatmul.mubr.bf16.gmra.mxu0 %v870_v33 }
 0x2ac   : > { %v976_v35 = vpop.f32.mrf.mxu0 }
 0x2ad   : > { %v977_v36 = vadd.f32 %v2187_v34, %v976_v35 }
 0x2ae   : > { %v1566_v38 = vpop.f32.mrf.mxu0 }
 0x2af   : > { %v1043_v37 = vmul.f32 1.442695, %v977_v36  ;;  %vm1030_vm0 = vcmp.gt.f32.partialorder %v977_v36, 0.0 }
 0x2b0   : > { %v979_v39 = vpop.f32.mrf.mxu0 }
 0x2b1   : > { %1728 = vpow2.f32 %v1043_v37  ;;  %v980_v40 = vadd.f32 %v2187_v34, %v979_v39 }
 0x2b2   : > { %v1567_v41 = vpop.f32.mrf.mxu0 }
 0x2b3   : > { %v1045_v1 = vmul.f32 1.442695, %v980_v40  ;;  %vm1031_vm13 = vcmp.gt.f32.partialorder %v980_v40, 0.0 }
 0x2b4   : > { %v984_v42 = vpop.f32.mrf.mxu0 }
 0x2b5   : > { %1730 = vpow2.f32 %v1045_v1  ;;  %v985_v43 = vadd.f32 %v2187_v34, %v984_v42 }
 0x2b6   : > { %v1570_v44 = vpop.f32.mrf.mxu0 }
 0x2b7   : > { %v1047_v45 = vmul.f32 1.442695, %v985_v43  ;;  %vm1032_vm14 = vcmp.gt.f32.partialorder %v985_v43, 0.0 }
 0x2b8   : > { %v987_v46 = vpop.f32.mrf.mxu0 }
 0x2b9   : > { %1732 = vpow2.f32 %v1047_v45  ;;  %v988_v47 = vadd.f32 %v2187_v34, %v987_v46 }
 0x2ba   : > { %v1571_v22 = vpop.f32.mrf.mxu0 }
 0x2bb   : > { %v1049_v48 = vmul.f32 1.442695, %v988_v47  ;;  %vm1033_vm15 = vcmp.gt.f32.partialorder %v988_v47, 0.0 }
 0x2bc   : > { %v992_v51 = vpop.f32.mrf.mxu0 }
 0x2bd   : > { %1734 = vpow2.f32 %v1049_v48  ;;  %v2194_v50 = vadd.f32 %v2187_v34, %v992_v51 }
 0x2be   : > { %v1729_v52 = vpop.eup %1728  ;;  %v1574_v53 = vpop.f32.mrf.mxu0 }
 0x2bf   : > { %v1339_v49 = vadd.f32 -1.0, %v1729_v52  ;;  %v1051_v54 = vmul.f32 1.442695, %v2194_v50  ;;  %vm1034_vm1 = vcmp.gt.f32.partialorder %v2194_v50, 0.0 }
 0x2c0   : > { %v995_v55 = vpop.f32.mrf.mxu0 }
 0x2c1   : > { %v1082_v57 = vmul.f32 1.6732632, %v1339_v49  ;;  %1736 = vpow2.f32 %v1051_v54  ;;  %v2198_v56 = vadd.f32 %v2187_v34, %v995_v55 }
 0x2c2   : > { %v1731_v58 = vpop.eup %1730  ;;  %v1575_v59 = vpop.f32.mrf.mxu0 }
 0x2c3   : > { %v1340_v61 = vadd.f32 -1.0, %v1731_v58  ;;  %v1053_v62 = vmul.f32 1.442695, %v2198_v56  ;;  %v1095_v2 = vsel %vm1030_vm0, %v977_v36, %v1082_v57  ;;  %vm1035_vm2 = vcmp.gt.f32.partialorder %v2198_v56, 0.0 }
 0x2c4   : > { %v1000_v63 = vpop.f32.mrf.mxu0  ;;  %v1108_v10 = vmul.f32 1.050701, %v1095_v2 }
 0x2c5   : > { %v1083_v4 = vmul.f32 1.6732632, %v1340_v61  ;;  %1738 = vpow2.f32 %v1053_v62  ;;  %v2204_v5 = vadd.f32 %v2187_v34, %v1000_v63 }
 0x2c6   : > { %v1733_v6 = vpop.eup %1732  ;;  %v1578_v7 = vpop.f32.mrf.mxu0 }
 0x2c7   : > { %v1096_v8 = vsel %vm1031_vm13, %v980_v40, %v1083_v4  ;;  %v1341_v3 = vadd.f32 -1.0, %v1733_v6  ;;  %v1055_v9 = vmul.f32 1.442695, %v2204_v5  ;;  %vm1036_vm3 = vcmp.gt.f32.partialorder %v2204_v5, 0.0 }
 0x2c8   : > { %v1109_v32 = vmul.f32 1.050701, %v1096_v8  ;;  %v1003_v11 = vpop.f32.mrf.mxu0 }
 0x2c9   : > { %v1084_v12 = vmul.f32 1.6732632, %v1341_v3  ;;  %1740 = vpow2.f32 %v1055_v9  ;;  %v2208_v13 = vadd.f32 %v2187_v34, %v1003_v11 }
 0x2ca   : > { %v1735_v14 = vpop.eup %1734  ;;  %v1389_v60 = vpack.c.bf16 %v1109_v32, %v1108_v10  ;;  %v1579_v0 = vpop.f32.mrf.mxu0 }
 0x2cb   : > { %v1342_v15 = vadd.f32 -1.0, %v1735_v14  ;;  %v1057_v16 = vmul.f32 1.442695, %v2208_v13  ;;  %v1097_v18 = vsel %vm1032_vm14, %v985_v43, %v1084_v12  ;;  %vm1037_vm4 = vcmp.gt.f32.partialorder %v2208_v13, 0.0 }
 0x2cc   : > { %1390 = vst [vmem:[%s2211_s19] sm:$0xff] %v1389_v60   ;;  %v1008_v17 = vpop.f32.mrf.mxu0  ;;  %v1110_v27 = vmul.f32 1.050701, %v1097_v18 }
 0x2cd   : > { %v1085_v19 = vmul.f32 1.6732632, %v1342_v15  ;;  %1742 = vpow2.f32 %v1057_v16  ;;  %v2215_v21 = vadd.f32 %v2187_v34, %v1008_v17 }
 0x2ce   : > { %v1737_v23 = vpop.eup %1736  ;;  %v1582_v20 = vpop.f32.mrf.mxu0 }
 0x2cf   : > { %v1098_v24 = vsel %vm1033_vm15, %v988_v47, %v1085_v19  ;;  %v1343_v25 = vadd.f32 -1.0, %v1737_v23  ;;  %v1059_v26 = vmul.f32 1.442695, %v2215_v21  ;;  %vm1038_vm5 = vcmp.gt.f32.partialorder %v2215_v21, 0.0 }
 0x2d0   : > { %v1111_v28 = vmul.f32 1.050701, %v1098_v24  ;;  %v1011_v29 = vpop.f32.mrf.mxu0 }
 0x2d1   : > { %v1086_v30 = vmul.f32 1.6732632, %v1343_v25  ;;  %1744 = vpow2.f32 %v1059_v26  ;;  %v1012_v31 = vadd.f32 %v2187_v34, %v1011_v29 }
 0x2d2   : > { %v1739_v33 = vpop.eup %1738  ;;  %v1394_v35 = vpack.c.bf16 %v1111_v28, %v1110_v27  ;;  %v1583_v36 = vpop.f32.mrf.mxu0 }
 0x2d3   : > { %v1344_v38 = vadd.f32 -1.0, %v1739_v33  ;;  %v1061_v37 = vmul.f32 1.442695, %v1012_v31  ;;  %v1099_v40 = vsel %vm1034_vm1, %v2194_v50, %v1086_v30  ;;  %vm1039_vm6 = vcmp.gt.f32.partialorder %v1012_v31, 0.0 }
 0x2d4   : > { %1416 = vst [vmem:[%s2211_s19 + $0x8] sm:$0xff] %v1394_v35   ;;  %v1016_v39 = vpop.f32.mrf.mxu0  ;;  %v1112_v47 = vmul.f32 1.050701, %v1099_v40 }
 0x2d5   : > { %v1087_v41 = vmul.f32 1.6732632, %v1344_v38  ;;  %1746 = vpow2.f32 %v1061_v37  ;;  %v1017_v1 = vadd.f32 %v2187_v34, %v1016_v39 }
 0x2d6   : > { %v1741_v42 = vpop.eup %1740  ;;  %v1586_v43 = vpop.f32.mrf.mxu0 }
 0x2d7   : > { %v1100_v44 = vsel %vm1035_vm2, %v2198_v56, %v1087_v41  ;;  %v1345_v45 = vadd.f32 -1.0, %v1741_v42  ;;  %v1063_v46 = vmul.f32 1.442695, %v1017_v1  ;;  %vm1040_vm7 = vcmp.gt.f32.partialorder %v1017_v1, 0.0 }
 0x2d8   : > { %v1113_v22 = vmul.f32 1.050701, %v1100_v44  ;;  %v1019_v48 = vpop.f32.mrf.mxu0 }
 0x2d9   : > { %v1088_v51 = vmul.f32 1.6732632, %v1345_v45  ;;  %1748 = vpow2.f32 %v1063_v46  ;;  %v1020_v50 = vadd.f32 %v2187_v34, %v1019_v48 }
 0x2da   : > { %v1743_v52 = vpop.eup %1742  ;;  %v1399_v53 = vpack.c.bf16 %v1113_v22, %v1112_v47  ;;  %v1587_v49 = vpop.f32.mrf.mxu0 }
 0x2db   : > { %v1346_v54 = vadd.f32 -1.0, %v1743_v52  ;;  %v1065_v55 = vmul.f32 1.442695, %v1020_v50  ;;  %v1101_v56 = vsel %vm1036_vm3, %v2204_v5, %v1088_v51  ;;  %vm1041_vm8 = vcmp.gt.f32.partialorder %v1020_v50, 0.0 }
 0x2dc   : > { %1417 = vst [vmem:[%s2211_s19 + $0x10] sm:$0xff] %v1399_v53   ;;  %v1024_v57 = vpop.f32.mrf.mxu0  ;;  %v1114_v6 = vmul.f32 1.050701, %v1101_v56 }
 0x2dd   : > { %v1089_v58 = vmul.f32 1.6732632, %v1346_v54  ;;  %1750 = vpow2.f32 %v1065_v55  ;;  %v1025_v59 = vadd.f32 %v2187_v34, %v1024_v57 }
 0x2de   : > { %v1745_v61 = vpop.eup %1744  ;;  %v1590_v62 = vpop.f32.mrf.mxu0 }
 0x2df   : > { %v1102_v63 = vsel %vm1037_vm4, %v2208_v13, %v1089_v58  ;;  %v1347_v2 = vadd.f32 -1.0, %v1745_v61  ;;  %v1067_v4 = vmul.f32 1.442695, %v1025_v59  ;;  %vm1042_vm9 = vcmp.gt.f32.partialorder %v1025_v59, 0.0 }
 0x2e0   : > { %v1115_v7 = vmul.f32 1.050701, %v1102_v63  ;;  %v1027_v8 = vpop.f32.mrf.mxu0 }
 0x2e1   : > { %v1090_v3 = vmul.f32 1.6732632, %v1347_v2  ;;  %1752 = vpow2.f32 %v1067_v4 }
 0x2e2   : > { %v1747_v9 = vpop.eup %1746  ;;  %v1404_v5 = vpack.c.bf16 %v1115_v7, %v1114_v6  ;;  %v1591_v10 = vpop.f32.mrf.mxu0 }
 0x2e3   : > { %v1348_v32 = vadd.f32 -1.0, %v1747_v9  ;;  %v1103_v34 = vsel %vm1038_vm5, %v2215_v21, %v1090_v3 }
 0x2e4   : > { %1418 = vst [vmem:[%s2211_s19 + $0x18] sm:$0xff] %v1404_v5   ;;  %v1116_v60 = vmul.f32 1.050701, %v1103_v34 }
 0x2e5   : > { %v1091_v11 = vmul.f32 1.6732632, %v1348_v32 }
 0x2e6   : > { %v1749_v12 = vpop.eup %1748 }
 0x2e7   : > { %v1104_v13 = vsel %vm1039_vm6, %v1012_v31, %v1091_v11  ;;  %v1349_v14 = vadd.f32 -1.0, %v1749_v12 }
 0x2e8   : > { %v1117_v0 = vmul.f32 1.050701, %v1104_v13 }
 0x2e9   : > { %v1092_v15 = vmul.f32 1.6732632, %v1349_v14 }
 0x2ea   : > { %v1751_v16 = vpop.eup %1750  ;;  %v1409_v17 = vpack.c.bf16 %v1117_v0, %v1116_v60 }
 0x2eb   : > { %v1350_v18 = vadd.f32 -1.0, %v1751_v16  ;;  %v1105_v19 = vsel %vm1040_vm7, %v1017_v1, %v1092_v15 }
 0x2ec   : > { %1419 = vst [vmem:[%s2211_s19 + $0x20] sm:$0xff] %v1409_v17   ;;  %v1118_v25 = vmul.f32 1.050701, %v1105_v19 }
 0x2ed   : > { %v1093_v23 = vmul.f32 1.6732632, %v1350_v18 }
 0x2ee   : > { %v1753_v20 = vpop.eup %1752 }
 0x2ef   : > { %v1106_v21 = vsel %vm1041_vm8, %v1020_v50, %v1093_v23  ;;  %v1351_v24 = vadd.f32 -1.0, %v1753_v20 }
 0x2f0   : > { %v1119_v26 = vmul.f32 1.050701, %v1106_v21 }
 0x2f1   : > { %v1094_v27 = vmul.f32 1.6732632, %v1351_v24 }
 0x2f2   : > { %v1414_v28 = vpack.c.bf16 %v1119_v26, %v1118_v25 }
 0x2f3   : > { %v1107_v29 = vsel %vm1042_vm9, %v1025_v59, %v1094_v27 }
 0x2f4   : > { %1420 = vst [vmem:[%s2211_s19 + $0x28] sm:$0xff] %v1414_v28   ;;  %v1120_v30 = vmul.f32 1.050701, %v1107_v29  ;;  %1194 = sbr.rel (!%p1899_p5) target bundleno = 788 (0x314), region = 52 }
 0x2f6   : > { %v1384_v31 = vpack.c.bf16 %v1120_v30, %v1120_v30 }
 0x2f8   : > { %1186 = vst [vmem:[%s2211_s19 + $0x30] sm:$0xf] %v1384_v31 }
 0x2f9   : > { %s2315_s21 = smov (!%p1197_p11, %s1196_s21), 13 }
 0x2fa   : > { %s2245_s22 = sshll.u32 %s2315_s21, 6 }
 0x2fb   : > { %s1201_s23 = ssub.s32 832, %s2245_s22 }
 0x2fc   : > { %1202 = vsyncadd %s2240_s20, %s1201_s23  ;;  %p1366_p12 = scmp.ne.s32.totalorder %s2245_s22, 0  ;;  %s1385_s29 = smul.u32 832, %s1882_s28 }
 0x2fd   : > { %s1207_s8 = sshll.u32 %s2211_s19, 4  ;;  %s1818_s14 = smov [#allocation2]   ;;  %s2257_s8 = int_to_ptr.vmem [resolvable:$true] %s1207_s8 }
 0x2fe   : > { %s2255_s13 = scalar_lea.hbm %s2307_s7, %s1385_s29  ;;  %s1754_s17 = scalar_lea.vmem %s2257_s8, %s2245_s22 }
 0x2ff   : > { %p1755_p13 = scmp.ne.s32.totalorder %s2257_s8, %s1754_s17  ;;  %s1758_s15 = sshll.u32 %s1818_s14, 4  ;;  %s1759_s15 = int_to_ptr.vmem [resolvable:$false] %s1758_s15 }
 0x300   : > { %s1760_s28 = scalar_lea.vmem %s1759_s15, 1664  ;;  %p1761_p2 = scmp.lt.s32.totalorder %s2257_s8, %s1759_s15 }
 0x301   : > { %p1756_p0 = pnand %p1755_p13, %p1366_p12  ;;  %p1762_p3 = scmp.lt.s32.totalorder %s1760_s28, %s1754_s17 }
 0x303   : > { %p1757_p1 = pneg %p1756_p0  ;;  %p1763_p4 = por %p1762_p3, %p1761_p2 }
 0x305   : > { %p1764_p5 = pnand %p1763_p4, %p1757_p1 }
 0x307   : > { %1767 = shalt.err (!%p1764_p5)
}
 0x308   : > { %s1768_s16 = scalar_lea.hbm %s2255_s13, %s2245_s22  ;;  %s1772_s21 = scalar_lea.hbm %s2307_s7, 1600 }
 0x309   : > { %p1769_p7 = scmp.ne.s32.totalorder %s2255_s13, %s1768_s16  ;;  %p1773_p10 = scmp.lt.s32.totalorder %s2255_s13, %s2307_s7 }
 0x30a   : > { %p1774_p11 = scmp.lt.s32.totalorder %s1772_s21, %s1768_s16 }
 0x30b   : > { %p1770_p8 = pnand %p1769_p7, %p1366_p12 }
 0x30c   : > { %p1775_p13 = por %p1774_p11, %p1773_p10 }
 0x30d   : > { %p1771_p9 = pneg %p1770_p8 }
 0x30f   : > { %p1776_p0 = pnand %p1775_p13, %p1771_p9 }
 0x311   : > { %1779 = shalt.err (!%p1776_p0)
}
 0x312   : > { %s1819_s11 = smov 64   ;;  %s1820_s9 = smov 4  }
 0x313   : > { %1213 = dma.vmem_to_hbm [thread:$0]  (%p1366_p12), %s2257_s8, %s2245_s22, %s2255_s13, %s2240_s20, %s1819_s11, %s1819_s11, %s1820_s9  }
 0x314 PF: > { %p1610_p1 = scmp.ge.s32.totalorder %s1814_s27, 2  ;;  %s1222_s17 = sand.u32 1, %s1802_s24  }
 0x315   : > { %s1223_s14 = scalar_lea.sflag [#allocation3], %s1222_s17 }
 0x316   : > { %p1607_p2 = pnand %p1610_p1, %p1903_p6 }
 0x318   : > { %p1608_p3 = pneg %p1607_p2 }
 0x31a   : > { %1797 = dma.done.wait (%p1608_p3), %s1223_s14, 832  }
 0x31b   : > { %1799 = vsyncadd (%p1608_p3), %s1223_s14, 4294966464  ;;  %p17_p4 = scmp.ge.s32.totalorder %s1886_s30, 4   ;;  %s2310_s24 = smov %s1806_s25 }
 0x31c   : > { %s2311_s25 = smov %s1810_s26  ;;  %s2312_s26 = smov %s1897_s10 }
 0x31d   : > { %s2313_s27 = smov %s1886_s30  ;;  %19 = sbr.rel (!%p17_p4) target bundleno = 3 (0x3), region = 83 }
 0x322   :  { %1228 = vsyncpa [#allocation3], 1 }
 0x323   :  { %1230 = vsyncpa [#allocation3 + $0x1], 1 }

</bundles_post_ra>
